<compile_context>
chip_gen: v7x
topology: tpu7x:2x2x1
jax: 0.10.0
libtpu: 0.0.40
codegen_flags: <defaults>
</compile_context>

<pallas_src>
import functools

import jax
import jax.numpy as jnp
from jax import lax
from jax.experimental import pallas as pl
from jax.experimental.pallas import tpu as pltpu


def _cost_adjusted_cel_kernel(logits_ref, true_ref, cw_ref,
                              out_l2_ref, out_w_ref,
                              sum_l2_ref, sum_w_ref,
                              *, n_rows, tiles_per_chunk):
    p = pl.program_id(0)   # parallel chunk (megacore axis on v7x)
    t = pl.program_id(1)   # tile within chunk (accumulator-carried)

    @pl.when(t == 0)
    def _init():
        sum_l2_ref[...] = jnp.zeros_like(sum_l2_ref)
        sum_w_ref[...] = jnp.zeros_like(sum_w_ref)

    logits = logits_ref[...].astype(jnp.float32)      # (TILE_N, C)
    truetarget = true_ref[...]                        # (TILE_N, 1) int32
    tile_n, c = logits.shape

    # --- fused log-softmax pieces (no log_probs materialization) ---
    m = jnp.max(logits, axis=1, keepdims=True)                              # (TILE_N, 1)
    lse = jnp.log(jnp.sum(jnp.exp(logits - m), axis=1, keepdims=True))      # (TILE_N, 1)

    # --- argmax over classes (first maximal index); argmax(log_softmax)==argmax(logits) ---
    col_iota = lax.broadcasted_iota(jnp.int32, (tile_n, c), 1)
    pred = jnp.min(jnp.where(logits >= m, col_iota, c), axis=1, keepdims=True)  # (TILE_N, 1)

    # --- log prob at the true super-class: logits[i, true] - m - lse ---
    onehot_true = (col_iota == truetarget).astype(jnp.float32)              # (TILE_N, C)
    logit_true = jnp.sum(onehot_true * logits, axis=1, keepdims=True)       # (TILE_N, 1)
    lp_true = logit_true - m - lse                                          # (TILE_N, 1)

    # --- w[i] = class_weights[truetarget[i], pred[i]] ---
    if cw_ref.shape[0] == 1:
        # Small C: flattened one-hot select on the VPU (no padded MXU matmul).
        cw_flat = cw_ref[...]                                               # (1, C*C)
        flat_idx = truetarget * c + pred                                    # (TILE_N, 1)
        flat_iota = lax.broadcasted_iota(jnp.int32, (tile_n, c * c), 1)
        w = jnp.sum(jnp.where(flat_iota == flat_idx, cw_flat, 0.0),
                    axis=1, keepdims=True)                                  # (TILE_N, 1)
    else:
        # Large C fallback: one-hot row gather through the MXU.
        onehot_pred = (col_iota == pred).astype(jnp.float32)
        row_w = jnp.dot(onehot_true, cw_ref[...],
                        preferred_element_type=jnp.float32)                 # (TILE_N, C)
        w = jnp.sum(row_w * onehot_pred, axis=1, keepdims=True)             # (TILE_N, 1)

    # --- mask padded tail rows (rows past the real batch size) ---
    row_iota = lax.broadcasted_iota(jnp.int32, (tile_n, 1), 0)
    global_row = (p * tiles_per_chunk + t) * tile_n + row_iota
    valid = global_row < n_rows

    sum_l2_ref[...] += jnp.sum(jnp.where(valid, -w * lp_true, 0.0), keepdims=True)
    sum_w_ref[...] += jnp.sum(jnp.where(valid, w, 0.0), keepdims=True)

    @pl.when(t == pl.num_programs(1) - 1)
    def _finalize():
        out_l2_ref[...] = jnp.broadcast_to(sum_l2_ref[...], out_l2_ref.shape)
        out_w_ref[...] = jnp.broadcast_to(sum_w_ref[...], out_w_ref.shape)


def _pick_tile_n(n, c):
    if n <= 512:
        return n  # full batch in one tile (block == full dim, always legal)
    # Keep the double-buffered f32 logits tile around <= 8 MiB; multiple of 8 sublanes.
    tile = (8 * 1024 * 1024) // max(1, 2 * c * 4)
    return max(8, min(512, (tile // 8) * 8))


def cost_adjusted_cross_entropy_loss(logits, target, class_weights, super_classes,
                                     prev_passed=None, tile_n=None):
    """Forward pass. Returns (scalar loss, prev_passed)."""
    n, c = logits.shape
    class_weights = class_weights.astype(jnp.float32)

    # Super-class lookup hoisted to the wrapper: trivial XLA gather, exact
    # truncation like torch's .long().
    truetarget = jnp.take(super_classes.astype(jnp.float32),
                          target.astype(jnp.int32)).astype(jnp.int32)
    true2d = truetarget.reshape(n, 1)

    if tile_n is None:
        tile_n = _pick_tile_n(n, c)
    n_tiles = pl.cdiv(n, tile_n)

    # Megacore split: 2 parallel chunks (one per v7x TensorCore) when the tile
    # count divides evenly (so no grid step maps to a fully-OOB input block);
    # otherwise a single chunk. Harmless on single-TC v5e/v6e.
    num_chunks = 2 if (n_tiles >= 2 and n_tiles % 2 == 0) else 1
    tiles_per_chunk = n_tiles // num_chunks
    grid = (num_chunks, tiles_per_chunk)

    # Small-C path uses a flattened (1, C*C) weights tile; large-C uses (C, C) + MXU.
    use_flat_gather = (c * c) <= 4096
    cw_in = class_weights.reshape(1, c * c) if use_flat_gather else class_weights
    cw_block = (1, c * c) if use_flat_gather else (c, c)

    kernel = functools.partial(_cost_adjusted_cel_kernel, n_rows=n,
                               tiles_per_chunk=tiles_per_chunk)

    out_l2, out_w = pl.pallas_call(
        kernel,
        out_shape=(jax.ShapeDtypeStruct((num_chunks, 8, 128), jnp.float32),
                   jax.ShapeDtypeStruct((num_chunks, 8, 128), jnp.float32)),
        grid_spec=pltpu.PrefetchScalarGridSpec(
            num_scalar_prefetch=0,
            grid=grid,
            in_specs=[
                pl.BlockSpec((tile_n, c),
                             lambda p, t: (p * tiles_per_chunk + t, 0)),  # logits (pipelined)
                pl.BlockSpec((tile_n, 1),
                             lambda p, t: (p * tiles_per_chunk + t, 0)),  # truetarget tile
                pl.BlockSpec(cw_block, lambda p, t: (0, 0)),              # class_weights, resident
            ],
            out_specs=[
                pl.BlockSpec((1, 8, 128), lambda p, t: (p, 0, 0)),        # per-chunk sum_l2
                pl.BlockSpec((1, 8, 128), lambda p, t: (p, 0, 0)),        # per-chunk sum_w
            ],
            scratch_shapes=[
                pltpu.VMEM((1, 1), jnp.float32),   # sum_l2 accumulator
                pltpu.VMEM((1, 1), jnp.float32),   # sum_w accumulator
            ],
        ),
        compiler_params=pltpu.CompilerParams(
            dimension_semantics=("parallel", "arbitrary"),
            vmem_limit_bytes=32 * 1024 * 1024,
        ),
    )(logits, true2d, cw_in)

    loss = jnp.sum(out_l2[:, 0, 0]) / jnp.sum(out_w[:, 0, 0])
    return loss, prev_passed


def _reference(logits, target, class_weights, super_classes):
    """Pure-JAX reference mirroring the PyTorch forward exactly."""
    log_probs = jax.nn.log_softmax(logits.astype(jnp.float32), axis=1)
    truetarget = super_classes[target].astype(jnp.int32)
    pred = jnp.argmax(log_probs, axis=1)
    w = class_weights[truetarget, pred]
    lp_true = log_probs[jnp.arange(logits.shape[0]), truetarget]
    l2 = -w * lp_true
    return jnp.sum(l2) / jnp.sum(w)


if __name__ == "__main__":
    C, C_ORIG = 8, 16

    # Deterministic "parameters" (module __init__ takes class_weights, super_classes).
    # super_classes maps each of the C_ORIG original labels to a super-class in [0, C).
    super_classes = (jnp.arange(C_ORIG) % C).astype(jnp.float32)
    ri = jnp.arange(C, dtype=jnp.float32)[:, None]
    ci = jnp.arange(C, dtype=jnp.float32)[None, :]
    class_weights = 1.0 + 0.1 * jnp.abs(ri - ci)                     # (C, C), all positive

    key = jax.random.PRNGKey(0)

    # 1) Small batch, default tiling: single tile covering the whole batch.
    N1 = 20
    k1, k2, k3, k4 = jax.random.split(key, 4)
    logits1 = jax.random.normal(k1, (N1, C), dtype=jnp.float32)
    target1 = jax.random.randint(k2, (N1,), 0, C_ORIG, dtype=jnp.int32)
    ref1 = jax.block_until_ready(_reference(logits1, target1, class_weights, super_classes))
    loss1, passed = cost_adjusted_cross_entropy_loss(
        logits1, target1, class_weights, super_classes, prev_passed=None)
    loss1 = jax.block_until_ready(loss1)
    assert jnp.allclose(loss1, ref1, rtol=1e-5, atol=1e-6), (loss1, ref1)
    assert passed is None

    # 2) Forced small tile, odd tile count: multi-step "arbitrary" axis, carried
    #    accumulators, padded-tail-row masking (20 rows, tile of 8 -> 3 tiles).
    loss2, _ = cost_adjusted_cross_entropy_loss(
        logits1, target1, class_weights, super_classes, prev_passed=None, tile_n=8)
    loss2 = jax.block_until_ready(loss2)
    assert jnp.allclose(loss2, ref1, rtol=1e-5, atol=1e-6), (loss2, ref1)

    # 3) Even tile count: exercises the 2-chunk "parallel" (megacore) path plus a
    #    partial last tile (44 rows, tile of 8 -> 6 tiles -> 2 chunks x 3 tiles).
    N2 = 44
    logits3 = jax.random.normal(k3, (N2, C), dtype=jnp.float32)
    target3 = jax.random.randint(k4, (N2,), 0, C_ORIG, dtype=jnp.int32)
    ref3 = jax.block_until_ready(_reference(logits3, target3, class_weights, super_classes))
    loss3, _ = cost_adjusted_cross_entropy_loss(
        logits3, target3, class_weights, super_classes, prev_passed=None, tile_n=8)
    loss3 = jax.block_until_ready(loss3)
    assert jnp.allclose(loss3, ref3, rtol=1e-5, atol=1e-6), (loss3, ref3)

    print("KERNEL_OK")
</pallas_src>

<mosaic_0001>
module attributes {stable_mosaic.version = 11 : i64} {
  func.func @_cost_adjusted_cel_kernel(%arg0: i32, %arg1: i32, %arg2: memref<20x8xf32, #tpu.memory_space<vmem>>, %arg3: memref<20x1xi32, #tpu.memory_space<vmem>>, %arg4: memref<1x64xf32, #tpu.memory_space<vmem>>, %arg5: memref<1x8x128xf32, #tpu.memory_space<vmem>>, %arg6: memref<1x8x128xf32, #tpu.memory_space<vmem>>, %arg7: memref<1x1xf32, #tpu.memory_space<vmem>>, %arg8: memref<1x1xf32, #tpu.memory_space<vmem>>) attributes {dimension_semantics = [#tpu.dimension_semantics<parallel>, #tpu.dimension_semantics<arbitrary>], iteration_bounds = array<i64: 1, 1>, scalar_prefetch = 0 : i64, scratch_operands = 2 : i64, tpu.core_type = #tpu.core_type<tc>, window_params = [{transform_indices = @transform_0, window_bounds = array<i64: 20, 8>}, {transform_indices = @transform_1, window_bounds = array<i64: 20, 1>}, {pipeline_mode = #tpu.pipeline_mode<synchronous>, transform_indices = @transform_2, window_bounds = array<i64: 1, 64>}, {transform_indices = @transform_3, window_bounds = array<i64: 1, 8, 128>}, {transform_indices = @transform_4, window_bounds = array<i64: 1, 8, 128>}]} {
    %c0_i32 = arith.constant 0 : i32
    %0 = arith.cmpi eq, %arg1, %c0_i32 : i32
    %1 = arith.extui %0 : i1 to i32
    %c0_i32_0 = arith.constant 0 : i32
    %2 = arith.cmpi ne, %1, %c0_i32_0 : i32
    scf.if %2 {
      %cst_28 = arith.constant 0.000000e+00 : f32
      %76 = vector.broadcast %cst_28 : f32 to vector<1x1xf32>
      %c0_29 = arith.constant 0 : index
      %c0_30 = arith.constant 0 : index
      %77 = vector.load %arg7[%c0_29, %c0_30] : memref<1x1xf32, #tpu.memory_space<vmem>>, vector<1x1xf32>
      tpu.vector_store %arg7[%c0_29, %c0_30], %76 {strides = array<i32>} : memref<1x1xf32, #tpu.memory_space<vmem>>, vector<1x1xf32>,
      %cst_31 = arith.constant 0.000000e+00 : f32
      %78 = vector.broadcast %cst_31 : f32 to vector<1x1xf32>
      %c0_32 = arith.constant 0 : index
      %c0_33 = arith.constant 0 : index
      %79 = vector.load %arg8[%c0_32, %c0_33] : memref<1x1xf32, #tpu.memory_space<vmem>>, vector<1x1xf32>
      tpu.vector_store %arg8[%c0_32, %c0_33], %78 {strides = array<i32>} : memref<1x1xf32, #tpu.memory_space<vmem>>, vector<1x1xf32>,
    } else {
    }
    %c0 = arith.constant 0 : index
    %c0_1 = arith.constant 0 : index
    %3 = vector.load %arg2[%c0, %c0_1] : memref<20x8xf32, #tpu.memory_space<vmem>>, vector<20x8xf32>
    %c0_2 = arith.constant 0 : index
    %c0_3 = arith.constant 0 : index
    %4 = vector.load %arg3[%c0_2, %c0_3] : memref<20x1xi32, #tpu.memory_space<vmem>>, vector<20x1xi32>
    %cst = arith.constant dense<0xFF800000> : vector<20xf32>
    %5 = vector.multi_reduction <maximumf>, %3, %cst [1] : vector<20x8xf32> to vector<20xf32>
    %6 = vector.shape_cast %5 : vector<20xf32> to vector<20x1xf32>
    %7 = vector.broadcast %6 : vector<20x1xf32> to vector<20x8xf32>
    %8 = arith.subf %3, %7 : vector<20x8xf32>
    %9 = math.exp %8 : vector<20x8xf32>
    %cst_4 = arith.constant dense<0.000000e+00> : vector<20xf32>
    %10 = vector.multi_reduction <add>, %9, %cst_4 [1] : vector<20x8xf32> to vector<20xf32>
    %11 = vector.shape_cast %10 : vector<20xf32> to vector<20x1xf32>
    %12 = math.log %11 : vector<20x1xf32>
    %13 = tpu.iota {dimensions = array<i32: 1>} : vector<20x8xi32>
    %14 = vector.broadcast %6 : vector<20x1xf32> to vector<20x8xf32>
    %15 = arith.cmpf oge, %3, %14 : vector<20x8xf32>
    %c8_i32 = arith.constant 8 : i32
    %16 = vector.broadcast %c8_i32 : i32 to vector<20x8xi32>
    %17 = arith.select %15, %13, %16 : vector<20x8xi1>, vector<20x8xi32>
    %cst_5 = arith.constant dense<2147483647> : vector<20xi32>
    %18 = vector.multi_reduction <minsi>, %17, %cst_5 [1] : vector<20x8xi32> to vector<20xi32>
    %19 = vector.shape_cast %18 : vector<20xi32> to vector<20x1xi32>
    %20 = vector.broadcast %4 : vector<20x1xi32> to vector<20x8xi32>
    %21 = arith.cmpi eq, %13, %20 : vector<20x8xi32>
    %22 = arith.extui %21 : vector<20x8xi1> to vector<20x8xi32>
    %23 = arith.sitofp %22 : vector<20x8xi32> to vector<20x8xf32>
    %24 = arith.mulf %23, %3 : vector<20x8xf32>
    %cst_6 = arith.constant dense<0.000000e+00> : vector<20xf32>
    %25 = vector.multi_reduction <add>, %24, %cst_6 [1] : vector<20x8xf32> to vector<20xf32>
    %26 = vector.shape_cast %25 : vector<20xf32> to vector<20x1xf32>
    %27 = arith.subf %26, %6 : vector<20x1xf32>
    %28 = arith.subf %27, %12 : vector<20x1xf32>
    %c0_7 = arith.constant 0 : index
    %c0_8 = arith.constant 0 : index
    %29 = vector.load %arg4[%c0_7, %c0_8] : memref<1x64xf32, #tpu.memory_space<vmem>>, vector<1x64xf32>
    %c8_i32_9 = arith.constant 8 : i32
    %30 = vector.broadcast %c8_i32_9 : i32 to vector<20x1xi32>
    %31 = arith.muli %4, %30 : vector<20x1xi32>
    %32 = arith.addi %31, %19 : vector<20x1xi32>
    %33 = tpu.iota {dimensions = array<i32: 1>} : vector<20x64xi32>
    %34 = vector.broadcast %32 : vector<20x1xi32> to vector<20x64xi32>
    %35 = arith.cmpi eq, %33, %34 : vector<20x64xi32>
    %cst_10 = arith.constant 0.000000e+00 : f32
    %36 = vector.shape_cast %29 : vector<1x64xf32> to vector<1x64xf32>
    %37 = vector.broadcast %36 : vector<1x64xf32> to vector<20x64xf32>
    %38 = vector.broadcast %cst_10 : f32 to vector<20x64xf32>
    %39 = arith.select %35, %37, %38 : vector<20x64xi1>, vector<20x64xf32>
    %cst_11 = arith.constant dense<0.000000e+00> : vector<20xf32>
    %40 = vector.multi_reduction <add>, %39, %cst_11 [1] : vector<20x64xf32> to vector<20xf32>
    %41 = vector.shape_cast %40 : vector<20xf32> to vector<20x1xf32>
    %42 = tpu.iota {dimensions = array<i32: 0>} : vector<20x1xi32>
    %c1_i32 = arith.constant 1 : i32
    %43 = arith.muli %arg0, %c1_i32 : i32
    %44 = arith.addi %43, %arg1 : i32
    %c20_i32 = arith.constant 20 : i32
    %45 = arith.muli %44, %c20_i32 : i32
    %46 = vector.broadcast %45 : i32 to vector<20x1xi32>
    %47 = arith.addi %46, %42 : vector<20x1xi32>
    %c20_i32_12 = arith.constant 20 : i32
    %48 = vector.broadcast %c20_i32_12 : i32 to vector<20x1xi32>
    %49 = arith.cmpi slt, %47, %48 : vector<20x1xi32>
    %c0_13 = arith.constant 0 : index
    %c0_14 = arith.constant 0 : index
    %50 = vector.load %arg7[%c0_13, %c0_14] : memref<1x1xf32, #tpu.memory_space<vmem>>, vector<1x1xf32>
    %cst_15 = arith.constant 0.000000e+00 : f32
    %51 = vector.broadcast %cst_15 : f32 to vector<20x1xf32>
    %52 = arith.subf %51, %41 : vector<20x1xf32>
    %53 = arith.mulf %52, %28 : vector<20x1xf32>
    %cst_16 = arith.constant 0.000000e+00 : f32
    %54 = vector.broadcast %cst_16 : f32 to vector<20x1xf32>
    %55 = arith.select %49, %53, %54 : vector<20x1xi1>, vector<20x1xf32>
    %56 = vector.shape_cast %55 : vector<20x1xf32> to vector<1x20x1xf32>
    %cst_17 = arith.constant dense<0.000000e+00> : vector<1xf32>
    %57 = vector.multi_reduction <add>, %56, %cst_17 [1, 2] : vector<1x20x1xf32> to vector<1xf32>
    %58 = vector.shape_cast %57 : vector<1xf32> to vector<1x1x1xf32>
    %59 = vector.extract %58[0, 0, 0] : f32 from vector<1x1x1xf32>
    %60 = vector.broadcast %59 : f32 to vector<1x1xf32>
    %61 = arith.addf %50, %60 : vector<1x1xf32>
    %c0_18 = arith.constant 0 : index
    %c0_19 = arith.constant 0 : index
    %62 = vector.load %arg7[%c0_18, %c0_19] : memref<1x1xf32, #tpu.memory_space<vmem>>, vector<1x1xf32>
    tpu.vector_store %arg7[%c0_18, %c0_19], %61 {strides = array<i32>} : memref<1x1xf32, #tpu.memory_space<vmem>>, vector<1x1xf32>,
    %c0_20 = arith.constant 0 : index
    %c0_21 = arith.constant 0 : index
    %63 = vector.load %arg8[%c0_20, %c0_21] : memref<1x1xf32, #tpu.memory_space<vmem>>, vector<1x1xf32>
    %cst_22 = arith.constant 0.000000e+00 : f32
    %64 = vector.broadcast %cst_22 : f32 to vector<20x1xf32>
    %65 = arith.select %49, %41, %64 : vector<20x1xi1>, vector<20x1xf32>
    %66 = vector.shape_cast %65 : vector<20x1xf32> to vector<1x20x1xf32>
    %cst_23 = arith.constant dense<0.000000e+00> : vector<1xf32>
    %67 = vector.multi_reduction <add>, %66, %cst_23 [1, 2] : vector<1x20x1xf32> to vector<1xf32>
    %68 = vector.shape_cast %67 : vector<1xf32> to vector<1x1x1xf32>
    %69 = vector.extract %68[0, 0, 0] : f32 from vector<1x1x1xf32>
    %70 = vector.broadcast %69 : f32 to vector<1x1xf32>
    %71 = arith.addf %63, %70 : vector<1x1xf32>
    %c0_24 = arith.constant 0 : index
    %c0_25 = arith.constant 0 : index
    %72 = vector.load %arg8[%c0_24, %c0_25] : memref<1x1xf32, #tpu.memory_space<vmem>>, vector<1x1xf32>
    tpu.vector_store %arg8[%c0_24, %c0_25], %71 {strides = array<i32>} : memref<1x1xf32, #tpu.memory_space<vmem>>, vector<1x1xf32>,
    %c0_i32_26 = arith.constant 0 : i32
    %73 = arith.cmpi eq, %arg1, %c0_i32_26 : i32
    %74 = arith.extui %73 : i1 to i32
    %c0_i32_27 = arith.constant 0 : i32
    %75 = arith.cmpi ne, %74, %c0_i32_27 : i32
    scf.if %75 {
      %c0_28 = arith.constant 0 : index
      %c0_29 = arith.constant 0 : index
      %76 = vector.load %arg7[%c0_28, %c0_29] : memref<1x1xf32, #tpu.memory_space<vmem>>, vector<1x1xf32>
      %77 = vector.shape_cast %76 : vector<1x1xf32> to vector<1x1x1xf32>
      %78 = vector.broadcast %77 : vector<1x1x1xf32> to vector<1x8x128xf32>
      %c0_30 = arith.constant 0 : index
      %c0_31 = arith.constant 0 : index
      %c0_32 = arith.constant 0 : index
      %79 = vector.load %arg5[%c0_30, %c0_31, %c0_32] : memref<1x8x128xf32, #tpu.memory_space<vmem>>, vector<1x8x128xf32>
      tpu.vector_store %arg5[%c0_30, %c0_31, %c0_32], %78 {strides = array<i32>} : memref<1x8x128xf32, #tpu.memory_space<vmem>>, vector<1x8x128xf32>,
      %c0_33 = arith.constant 0 : index
      %c0_34 = arith.constant 0 : index
      %80 = vector.load %arg8[%c0_33, %c0_34] : memref<1x1xf32, #tpu.memory_space<vmem>>, vector<1x1xf32>
      %81 = vector.shape_cast %80 : vector<1x1xf32> to vector<1x1x1xf32>
      %82 = vector.broadcast %81 : vector<1x1x1xf32> to vector<1x8x128xf32>
      %c0_35 = arith.constant 0 : index
      %c0_36 = arith.constant 0 : index
      %c0_37 = arith.constant 0 : index
      %83 = vector.load %arg6[%c0_35, %c0_36, %c0_37] : memref<1x8x128xf32, #tpu.memory_space<vmem>>, vector<1x8x128xf32>
      tpu.vector_store %arg6[%c0_35, %c0_36, %c0_37], %82 {strides = array<i32>} : memref<1x8x128xf32, #tpu.memory_space<vmem>>, vector<1x8x128xf32>,
    } else {
    }
    return
  }
  func.func @transform_0(%arg0: i32, %arg1: i32) -> (i32, i32) {
    %c1_i32 = arith.constant 1 : i32
    %0 = arith.muli %arg0, %c1_i32 : i32
    %1 = arith.addi %0, %arg1 : i32
    %c0_i32 = arith.constant 0 : i32
    %c0_i32_0 = arith.constant 0 : i32
    return %1, %c0_i32 : i32, i32
  }
  func.func @transform_1(%arg0: i32, %arg1: i32) -> (i32, i32) {
    %c1_i32 = arith.constant 1 : i32
    %0 = arith.muli %arg0, %c1_i32 : i32
    %1 = arith.addi %0, %arg1 : i32
    %c0_i32 = arith.constant 0 : i32
    %c0_i32_0 = arith.constant 0 : i32
    return %1, %c0_i32 : i32, i32
  }
  func.func @transform_2(%arg0: i32, %arg1: i32) -> (i32, i32) {
    %c0_i32 = arith.constant 0 : i32
    %c0_i32_0 = arith.constant 0 : i32
    %c0_i32_1 = arith.constant 0 : i32
    return %c0_i32, %c0_i32_0 : i32, i32
  }
  func.func @transform_3(%arg0: i32, %arg1: i32) -> (i32, i32, i32) {
    %c0_i32 = arith.constant 0 : i32
    %c0_i32_0 = arith.constant 0 : i32
    %c0_i32_1 = arith.constant 0 : i32
    return %arg0, %c0_i32, %c0_i32_0 : i32, i32, i32
  }
  func.func @transform_4(%arg0: i32, %arg1: i32) -> (i32, i32, i32) {
    %c0_i32 = arith.constant 0 : i32
    %c0_i32_0 = arith.constant 0 : i32
    %c0_i32_1 = arith.constant 0 : i32
    return %arg0, %c0_i32, %c0_i32_0 : i32, i32, i32
  }
}

</mosaic_0001>

<bundles_post_ra>
// kernel: tpu_custom_call.1
= control target key start
LH: loop header
LB: loop body
LE: loop exit
PB: predicated region body
PF: predicated region fallthrough
CT: control target
= control target key end

     0   :  { %10 = vsyncpa [#allocation5], 0  ;;  %vm75_vm0 = vcmask 64512   ;;  %vm82_vm1 = vcmask 60416   ;;  %s599_s0 = inlined_call_operand.vmem [shape: f32[20,8], index: 0, kind: input, shape index: {}]   ;;  %s600_s1 = inlined_call_operand.vmem [shape: s32[20,1], index: 1, kind: input, shape index: {}]   ;;  %s601_s2 = inlined_call_operand.vmem [shape: f32[1,64], index: 2, kind: input, shape index: {}]   ;;  %s602_s3 = inlined_call_operand.hbm [shape: f32[1,8,128], index: 3, kind: output, shape index: {0}]   ;;  %s603_s4 = inlined_call_operand.hbm [shape: f32[1,8,128], index: 4, kind: output, shape index: {1}]  }
   0x1   :  { %v475_v0 = vld [vmem:[%s599_s0] sm:$0xff]  ;;  %v480_v1 = vld [vmem:[%s599_s0 + $0x10] sm:$0xf]  ;;  %v485_v2 = vld [vmem:[%s599_s0 + $0x8] sm:$0xff] }
   0x2   :  { %v76_v3 = vsel %vm75_vm0, %v475_v0, -inf  ;;  %v83_v4 = vsel %vm82_vm1, %v480_v1, -inf }
   0x3   :  { %11 = vsyncpa [#allocation7], 0  ;;  %77 = vmax.xlane.f32.xlu0 %v76_v3  ;;  %84 = vmax.xlane.f32.xlu1 %v83_v4  ;;  %v79_v5 = vsel %vm75_vm0, %v485_v2, -inf  ;;  %v110_v6 = vlaneseq  ;;  %v443_v23 = vmov 0   ;;  %v72_v36 = vld [vmem:[%s600_s1] sm:$0xff]  ;;  %v73_v38 = vld [vmem:[%s600_s1 + $0x8] sm:$0xff] }
   0x4   :  { %381 = vset.pattern.permute.xlu1 %v443_v23  ;;  %382 = vset.pattern.permute.xlu0 %v443_v23  ;;  %v74_v37 = vld [vmem:[%s600_s1 + $0x10] sm:$0xf]  ;;  %v200_v47 = vmul.u32 8, %v72_v36  ;;  %v201_v51 = vmul.u32 8, %v73_v38  ;;  %vm227_vm11 = vcmask 523264   ;;  %vm234_vm14 = vcmask 519168  }
   0x5   :  { %v494_v7 = vand.u32 127, %v110_v6  ;;  %v202_v61 = vmul.u32 8, %v74_v37  ;;  %s445_s28 = smov [#allocation4]   ;;  %s446_s30 = smov [#allocation6]  }
   0x6   :  { %s333_s29 = sshll.u32 %s445_s28, 4  ;;  %s343_s5 = sshll.u32 %s446_s30, 4  ;;  %s334_s29 = int_to_ptr.vmem [resolvable:$true] %s333_s29  ;;  %s568_s5 = int_to_ptr.vmem [resolvable:$true] %s343_s5 }
   0x7   :  { %80 = vmax.xlane.f32.xlu0 %v79_v5  ;;  %v444_v5 = vmov 0.0   ;;  %s395_s6 = scalar_lea.vmem %s334_s29, 128  ;;  %p400_p1 = scmp.lt.s32.totalorder %s334_s29, %s334_s29 }
   0x8   :  { %p396_p0 = scmp.ne.s32.totalorder %s334_s29, %s395_s6  ;;  %p401_p2 = scmp.lt.s32.totalorder %s395_s6, %s395_s6 }
   0xa   :  { %p402_p3 = por %p401_p2, %p400_p1 }
   0xc   :  { %p403_p4 = pnand %p402_p3, %p396_p0 }
  0x90   :  { %v496_v8 = vpop.xlane.xlu0 %77  ;;  %v498_v9 = vpop.xlane.xlu1 %84 }
  0x91   :  { %vm112_vm2 = vcmp.ge.f32.partialorder %v475_v0, %v496_v8  ;;  %vm114_vm3 = vcmp.ge.f32.partialorder %v480_v1, %v498_v9 }
  0x92   :  { %v115_v10 = vsel %vm112_vm2, %v494_v7, 8  ;;  %v117_v11 = vsel %vm114_vm3, %v494_v7, 8  ;;  %vm265_vm2 = vcmask 3072   ;;  %vm66_vm3 = vcmask 0  }
  0x93   :  { %v118_v12 = vsel %vm75_vm0, %v115_v10, 2147483647  ;;  %v148_v15 = vsel %vm82_vm1, %v117_v11, 2147483647  ;;  %67 = vst.msk [vmem:[#allocation2] sm:$0x1] %vm66_vm3, %v444_v5 }
  0x94   :  { %v507_v13 = vpop.xlane.xlu0 %80  ;;  %v120_v14 = vshra.s32 %v118_v12, 16  ;;  %v150_v16 = vshra.s32 %v148_v15, 16  ;;  %v119_v24 = vand.u32 65535, %v118_v12  ;;  %v149_v27 = vand.u32 65535, %v148_v15  ;;  %68 = vst.msk [vmem:[#allocation3] sm:$0x1] %vm66_vm3, %v444_v5 }
  0x95   :  { %vm113_vm4 = vcmp.ge.f32.partialorder %v485_v2, %v507_v13  ;;  %v87_v39 = vsub.f32 %v485_v2, %v507_v13 }
  0x96   :  { %v122_v17 = vcvt.s32.f32 %v120_v14  ;;  %v116_v18 = vsel %vm113_vm4, %v494_v7, 8  ;;  %v152_v20 = vcvt.s32.f32 %v150_v16  ;;  %v121_v26 = vcvt.s32.f32 %v119_v24 }
  0x97   :  { %v133_v19 = vsel %vm75_vm0, %v116_v18, 2147483647  ;;  %v151_v32 = vcvt.s32.f32 %v149_v27  ;;  %v91_v40 = vmul.f32 1.442695, %v87_v39  ;;  %v86_v14 = vsub.f32 %v475_v0, %v496_v8 }
  0x98   :  { %123 = vmin.xlane.f32.xlu1 %v122_v17  ;;  %v135_v21 = vshra.s32 %v133_v19, 16  ;;  %v134_v28 = vand.u32 65535, %v133_v19  ;;  %v88_v16 = vsub.f32 %v480_v1, %v498_v9 }
  0x99   :  { %383 = vpow2.f32 %v91_v40  ;;  %v89_v15 = vmul.f32 1.442695, %v86_v14 }
  0x9a   :  { %v137_v22 = vcvt.s32.f32 %v135_v21  ;;  %v136_v33 = vcvt.s32.f32 %v134_v28  ;;  %v370_v28 = vld [vmem:[%s601_s2] ss:$0 sm:$0xff] }
  0x9b   :  { %385 = vpow2.f32 %v89_v15 }
  0x9c   :  { %153 = vmin.xlane.f32.xlu1 %v152_v20  ;;  %138 = vmin.xlane.f32.xlu0 %v137_v22 }
  0xa3   :  { %v384_v41 = vpop.eup %383 }
  0xa4   :  { %v98_v42 = vsel %vm75_vm0, %v384_v41, 0.0  ;;  %v239_v41 = vshrl.u32 %v110_v6, 7 }
  0xa5   :  { %v386_v18 = vpop.eup %385 }
  0xa6   :  { %v95_v21 = vsel %vm75_vm0, %v386_v18, 0.0 }
 0x125   :  { %v124_v25 = vpop.xlane.xlu1 %123 }
 0x126   :  { %vm125_vm5 = vcmp.eq.f32.partialorder %v122_v17, %v124_v25  ;;  %v130_v43 = vcvt.f32.s32 %v124_v25  ;;  %v93_v17 = vmul.f32 1.442695, %v88_v16 }
 0x127   :  { %v126_v29 = vsel %vm125_vm5, %v121_v26, inf }
 0x128   :  { %127 = vmin.xlane.f32.xlu0 %v126_v29  ;;  %v131_v45 = vshll.u32 %v130_v43, 16  ;;  %387 = vpow2.f32 %v93_v17 }
 0x129   :  { %v154_v30 = vpop.xlane.xlu1 %153  ;;  %v139_v31 = vpop.xlane.xlu0 %138 }
 0x12a   :  { %vm155_vm6 = vcmp.eq.f32.partialorder %v152_v20, %v154_v30  ;;  %vm140_vm7 = vcmp.eq.f32.partialorder %v137_v22, %v139_v31  ;;  %v145_v46 = vcvt.f32.s32 %v139_v31  ;;  %v160_v49 = vcvt.f32.s32 %v154_v30 }
 0x12b   :  { %v156_v34 = vsel %vm155_vm6, %v151_v32, inf  ;;  %v141_v35 = vsel %vm140_vm7, %v136_v33, inf }
 0x12c   :  { %157 = vmin.xlane.f32.xlu0 %v156_v34  ;;  %142 = vmin.xlane.f32.xlu1 %v141_v35  ;;  %v146_v54 = vshll.u32 %v145_v46, 16  ;;  %v161_v58 = vshll.u32 %v160_v49, 16 }
 0x132   :  { %v388_v22 = vpop.eup %387 }
 0x13d   :  { %164 = vperm.xlu1 %381, %v72_v36  }
 0x141   :  { %170 = vperm.xlu1 %381, %v74_v37  }
 0x142   :  { %167 = vperm.xlu0 %382, %v73_v38  }
 0x161   :  { %99 = vadd.xlane.f32.xlu0 %v98_v42 }
 0x1b5   :  { %v128_v44 = vpop.xlane.xlu0 %127 }
 0x1b6   :  { %v129_v48 = vcvt.f32.s32 %v128_v44 }
 0x1b8   :  { %v132_v50 = vadd.s32 %v131_v45, %v129_v48  ;;  %v241_v48 = vadd.s32 16, %v239_v41 }
 0x1b9   :  { %v158_v52 = vpop.xlane.xlu0 %157  ;;  %v143_v53 = vpop.xlane.xlu1 %142 }
 0x1ba   :  { %v159_v55 = vcvt.f32.s32 %v158_v52  ;;  %v144_v56 = vcvt.f32.s32 %v143_v53  ;;  %v203_v57 = vadd.s32 %v200_v47, %v132_v50 }
 0x1bc   :  { %v147_v59 = vadd.s32 %v146_v54, %v144_v56  ;;  %207 = vperm.xlu1 %381, %v203_v57   ;;  %v162_v62 = vadd.s32 %v161_v58, %v159_v55 }
 0x1bd   :  { %v165_v60 = vpop.permute.xlu1 %164 }
 0x1be   :  { %v204_v63 = vadd.s32 %v201_v51, %v147_v59  ;;  %v205_v4 = vadd.s32 %v202_v61, %v162_v62  ;;  %vm172_vm9 = vcmp.eq.s32.totalorder %v494_v7, %v165_v60 }
 0x1bf   :  { %v367_v19 = vsel %vm172_vm9, 1.0, %v444_v5 }
 0x1c0   :  { %210 = vperm.xlu1 %381, %v204_v63   ;;  %v181_v23 = vmul.f32 %v367_v19, %v475_v0 }
 0x1c1   :  { %v171_v3 = vpop.permute.xlu1 %170  ;;  %v168_v20 = vpop.permute.xlu0 %167 }
 0x1c2   :  { %vm174_vm8 = vcmp.eq.s32.totalorder %v494_v7, %v171_v3  ;;  %vm173_vm10 = vcmp.eq.s32.totalorder %v494_v7, %v168_v20  ;;  %v184_v25 = vsel %vm75_vm0, %v181_v23, 0.0 }
 0x1c3   :  { %v369_v10 = vsel %vm174_vm8, 1.0, %v444_v5  ;;  %v368_v24 = vsel %vm173_vm10, 1.0, %v444_v5 }
 0x1c4   :  { %213 = vperm.xlu1 %381, %v205_v4   ;;  %v183_v11 = vmul.f32 %v369_v10, %v480_v1  ;;  %v101_v1 = vsel %vm82_vm1, %v388_v22, 0.0  ;;  %v182_v26 = vmul.f32 %v368_v24, %v485_v2 }
 0x1c6   :  { %v190_v12 = vsel %vm82_vm1, %v183_v11, 0.0  ;;  %v187_v27 = vsel %vm75_vm0, %v182_v26, 0.0  ;;  %vm261_vm0 = vcmask 7168   ;;  %vm250_vm1 = vcmp.lt.s32.totalorder %v241_v48, 20 }
 0x1c7   :  { %191 = vadd.xlane.f32.xlu0 %v190_v12 }
 0x1e8   :  { %96 = vadd.xlane.f32.xlu1 %v95_v21 }
 0x1ec   :  { %102 = vadd.xlane.f32.xlu1 %v101_v1 }
 0x1ee   :  { %v100_v38 = vpop.xlane.xlu0 %99 }
 0x1f0   :  { %185 = vadd.xlane.f32.xlu1 %v184_v25 }
 0x1f4   :  { %188 = vadd.xlane.f32.xlu1 %v187_v27 }
 0x23b   :  { %v208_v29 = vpop.permute.xlu1 %207 }
 0x23c   :  { %vm215_vm12 = vcmp.eq.s32.totalorder %v494_v7, %v208_v29 }
 0x23d   :  { %v224_v0 = vsel %vm215_vm12, %v370_v28, 0.0 }
 0x23e   :  { %v228_v30 = vsel %vm227_vm11, %v224_v0, 0.0  ;;  %v251_v0 = vld [vmem:[#allocation2] sm:$0x1] }
 0x23f   :  { %v211_v31 = vpop.permute.xlu1 %210  ;;  %229 = vadd.xlane.f32.xlu1 %v228_v30  ;;  %v281_v30 = vld [vmem:[#allocation3] sm:$0x1] }
 0x240   :  { %vm216_vm13 = vcmp.eq.s32.totalorder %v494_v7, %v211_v31 }
 0x241   :  { %v225_v32 = vsel %vm216_vm13, %v370_v28, 0.0 }
 0x242   :  { %v231_v2 = vsel %vm227_vm11, %v225_v32, 0.0 }
 0x243   :  { %v214_v33 = vpop.permute.xlu1 %213  ;;  %232 = vadd.xlane.f32.xlu0 %v231_v2 }
 0x244   :  { %vm217_vm15 = vcmp.eq.s32.totalorder %v494_v7, %v214_v33 }
 0x245   :  { %v226_v34 = vsel %vm217_vm15, %v370_v28, 0.0 }
 0x246   :  { %v235_v35 = vsel %vm234_vm14, %v226_v34, 0.0 }
 0x247   :  { %236 = vadd.xlane.f32.xlu1 %v235_v35 }
 0x254   :  { %v192_v44 = vpop.xlane.xlu0 %191 }
 0x255   :  { %v195_v57 = vsub.f32 %v192_v44, %v498_v9 }
 0x275   :  { %v97_v36 = vpop.xlane.xlu1 %96 }
 0x276   :  { %389 = vlog2.f32 %v97_v36 }
 0x277   :  { %391 = vlog2.f32 %v100_v38 }
 0x279   :  { %v103_v37 = vpop.xlane.xlu1 %102 }
 0x27a   :  { %393 = vlog2.f32 %v103_v37 }
 0x27d   :  { %v186_v39 = vpop.xlane.xlu1 %185 }
 0x27e   :  { %v193_v50 = vsub.f32 %v186_v39, %v496_v8 }
 0x280   :  { %v390_v42 = vpop.eup %389 }
 0x281   :  { %v189_v40 = vpop.xlane.xlu1 %188  ;;  %v392_v43 = vpop.eup %391  ;;  %v105_v47 = vmul.f32 0.6931472, %v390_v42 }
 0x282   :  { %v194_v45 = vsub.f32 %v189_v40, %v507_v13  ;;  %v107_v49 = vmul.f32 0.6931472, %v392_v43 }
 0x283   :  { %v196_v56 = vsub.f32 %v193_v50, %v105_v47 }
 0x284   :  { %v394_v7 = vpop.eup %393  ;;  %v197_v54 = vsub.f32 %v194_v45, %v107_v49 }
 0x285   :  { %v109_v53 = vmul.f32 0.6931472, %v394_v7 }
 0x287   :  { %v198_v61 = vsub.f32 %v195_v57, %v109_v53 }
 0x2cc   :  { %v230_v46 = vpop.xlane.xlu1 %229 }
 0x2cd   :  { %v252_v51 = vsub.f32 0.0, %v230_v46  ;;  %v285_v59 = vsel %vm261_vm0, %v230_v46, 0.0 }
 0x2cf   :  { %v255_v58 = vmul.f32 %v252_v51, %v196_v56 }
 0x2d0   :  { %v233_v52 = vpop.xlane.xlu0 %232 }
 0x2d1   :  { %v253_v55 = vsub.f32 0.0, %v233_v52  ;;  %v286_v6 = vsel %vm261_vm0, %v233_v52, 0.0  ;;  %v262_v12 = vsel %vm261_vm0, %v255_v58, 0.0 }
 0x2d2   :  { %v287_v8 = vadd.f32 %v286_v6, %v285_v59 }
 0x2d3   :  { %v256_v13 = vmul.f32 %v253_v55, %v197_v54 }
 0x2d4   :  { %v237_v60 = vpop.xlane.xlu1 %236 }
 0x2d5   :  { %v254_v62 = vsub.f32 0.0, %v237_v60  ;;  %v284_v63 = vsel %vm250_vm1, %v237_v60, 0.0  ;;  %v263_v4 = vsel %vm261_vm0, %v256_v13, 0.0 }
 0x2d6   :  { %v288_v3 = vsel %vm265_vm2, %v284_v63, 0.0  ;;  %v264_v14 = vadd.f32 %v263_v4, %v262_v12 }
 0x2d7   :  { %v257_v10 = vmul.f32 %v254_v62, %v198_v61  ;;  %v289_v11 = vadd.f32 %v288_v3, %v287_v8 }
 0x2d9   :  { %290 = vadd.xlane.f32.xlu1 %v289_v11  ;;  %v260_v9 = vsel %vm250_vm1, %v257_v10, 0.0 }
 0x2da   :  { %v266_v15 = vsel %vm265_vm2, %v260_v9, 0.0 }
 0x2db   :  { %v267_v16 = vadd.f32 %v266_v15, %v264_v14 }
 0x2dd   :  { %268 = vadd.xlane.f32.xlu0 %v267_v16 }
 0x366   :  { %v291_v17 = vpop.xlane.xlu1 %290 }
 0x367   :  { %v292_v18 = vrot.slane %v291_v17, 4 }
 0x369   :  { %v293_v19 = vadd.f32 %v292_v18, %v291_v17 }
 0x36a   :  { %v269_v20 = vpop.xlane.xlu0 %268 }
 0x36b   :  { %v294_v21 = vrot.slane %v293_v19, 2  ;;  %v270_v22 = vrot.slane %v269_v20, 4 }
 0x36d   :  { %v271_v23 = vadd.f32 %v270_v22, %v269_v20  ;;  %v295_v24 = vadd.f32 %v294_v21, %v293_v19 }
 0x36f   :  { %v272_v1 = vrot.slane %v271_v23, 2  ;;  %v296_v26 = vrot.slane %v295_v24, 1 }
 0x371   :  { %v273_v25 = vadd.f32 %v272_v1, %v271_v23  ;;  %v297_v29 = vadd.f32 %v296_v26, %v295_v24 }
 0x373   :  { %v274_v27 = vrot.slane %v273_v25, 1 }
 0x375   :  { %v275_v28 = vadd.f32 %v274_v27, %v273_v25 }
 0x377   :  { %373 = vpush %v275_v28 }
 0x378   :  { %375 = vpush %v297_v29 }
 0x3a8   :  { %s374_s2 = spop %373 }
 0x3a9   :  { %v277_v5 = vstv %s374_s2  ;;  %s376_s27 = spop %375 }
 0x3aa   :  { %v278_v31 = vadd.f32 %v277_v5, %v251_v0  ;;  %v299_v32 = vstv %s376_s27 }
 0x3ab   :  { %v300_v2 = vadd.f32 %v299_v32, %v281_v30 }
 0x3ac   :  { %280 = vst.msk [vmem:[#allocation2] sm:$0x1] %vm66_vm3, %v278_v31 }
 0x3ad   :  { %301 = vst.msk [vmem:[#allocation3] sm:$0x1] %vm66_vm3, %v300_v2 }
 0x3b3   :  { %v371_v33 = vld [vmem:[#allocation2] ss:$0 sm:$0xff] }
 0x3b4   :  { %v372_v34 = vld [vmem:[#allocation3] ss:$0 sm:$0xff]  ;;  %312 = vperm.xlu0 %382, %v371_v33  }
 0x3b5   :  { %323 = vperm.xlu1 %381, %v372_v34  }
 0x433   :  { %v313_v35 = vpop.permute.xlu0 %312 }
 0x434   :  { %v324_v36 = vpop.permute.xlu1 %323  ;;  %315 = vst [vmem:[#allocation4] sm:$0xff] %v313_v35 }
 0x435   :  { %326 = vst [vmem:[#allocation6] sm:$0xff] %v324_v36 }
 0x436   :  { %406 = shalt.err (!%p403_p4)
}
 0x437   :  { %s407_s9 = scalar_lea.hbm %s602_s3, 128 }
 0x438   :  { %p408_p5 = scmp.ne.s32.totalorder %s602_s3, %s407_s9  ;;  %p411_p6 = scmp.lt.u32.totalorder %s407_s9, %s602_s3 }
 0x43a   :  { %p413_p7 = pnand %p411_p6, %p408_p5 }
 0x43c   :  { %416 = shalt.err (!%p413_p7)
}
 0x43d   :  { %336 = dma.vmem_to_hbm [thread:$0]  %s334_s29, 128, %s602_s3, [#allocation5]  }
 0x43e   :  { %s417_s16 = scalar_lea.vmem %s568_s5, 128  ;;  %p422_p9 = scmp.lt.s32.totalorder %s568_s5, %s568_s5 }
 0x43f   :  { %p418_p8 = scmp.ne.s32.totalorder %s568_s5, %s417_s16  ;;  %p423_p10 = scmp.lt.s32.totalorder %s417_s16, %s417_s16 }
 0x441   :  { %p424_p11 = por %p423_p10, %p422_p9 }
 0x443   :  { %p425_p12 = pnand %p424_p11, %p418_p8 }
 0x445   :  { %428 = shalt.err (!%p425_p12)
}
 0x446   :  { %s429_s19 = scalar_lea.hbm %s603_s4, 128 }
 0x447   :  { %p430_p13 = scmp.ne.s32.totalorder %s603_s4, %s429_s19  ;;  %p433_p0 = scmp.lt.u32.totalorder %s429_s19, %s603_s4 }
 0x449   :  { %p435_p1 = pnand %p433_p0, %p430_p13 }
 0x44b   :  { %438 = shalt.err (!%p435_p1)
}
 0x44c   :  { %346 = dma.vmem_to_hbm [thread:$0]  %s568_s5, 128, %s603_s4, [#allocation7]  }
 0x44d   :  { %439 = dma.done.wait [#allocation5], 128  }
 0x44e   :  { %440 = vsyncadd [#allocation5], 4294967168 }
 0x44f   :  { %441 = dma.done.wait [#allocation7], 128  }
 0x450   :  { %442 = vsyncadd [#allocation7], 4294967168 }
 0x451   :  { %353 = vsyncpa [#allocation5], 1 }
 0x452   :  { %354 = vsyncpa [#allocation7], 1 }

</bundles_post_ra>
